<compile_context>
chip_gen: v7x
topology: tpu7x:2x2x1
jax: 0.10.0
libtpu: 0.0.40
codegen_flags: <defaults>
</compile_context>

<pallas_src>
import functools

import jax
import jax.numpy as jnp
from jax.experimental import pallas as pl
from jax.experimental.pallas import tpu as pltpu

_NEG = -1e30  # bias for padded class columns -> exp() == 0 after max-subtract


def _round_up(x, m):
    return (x + m - 1) // m * m


def _shared_fea_kernel(fea_ref, w_ref, b_ref, out_ref, *, num_heads, c_pad):
    """One grid step = one N tile, all heads fused into one matmul.

    fea_ref: (tn, D)        shared features
    w_ref:   (D, H*Cpad)    packed transposed weights (resident in VMEM)
    b_ref:   (1, H*Cpad)    packed biases (pad columns = -1e30)
    out_ref: (tn, H*Cpad)   per-head softmax probabilities (pad columns ~ 0)
    """
    logits = jnp.dot(fea_ref[...], w_ref[...],
                     preferred_element_type=jnp.float32) + b_ref[...]
    # per-head numerically-stable softmax on 128-lane-aligned segments
    for h in range(num_heads):
        lo, hi = h * c_pad, (h + 1) * c_pad
        seg = logits[:, lo:hi]
        m = jnp.max(seg, axis=-1, keepdims=True)
        e = jnp.exp(seg - m)
        inv = pl.reciprocal(jnp.sum(e, axis=-1, keepdims=True), approx=True)
        out_ref[:, lo:hi] = (e * inv).astype(out_ref.dtype)


def _multi_fea_kernel(fea_ref, w_ref, b_ref, out_ref):
    """One grid step = one N tile, per-head features (batched over H).

    fea_ref: (H, tn, D), w_ref: (H, D, Cpad), b_ref: (H, 1, Cpad),
    out_ref: (H, tn, Cpad)
    """
    logits = jax.lax.dot_general(
        fea_ref[...], w_ref[...],
        dimension_numbers=(((2,), (1,)), ((0,), (0,))),
        preferred_element_type=jnp.float32) + b_ref[...]
    m = jnp.max(logits, axis=-1, keepdims=True)
    e = jnp.exp(logits - m)
    inv = pl.reciprocal(jnp.sum(e, axis=-1, keepdims=True), approx=True)
    out_ref[...] = (e * inv).astype(out_ref.dtype)


def sem_head_multi_forward(fea, weights, biases, *, block_n=512):
    """SemHeadMulti.forward.

    fea:     (N, D) shared features, OR list/tuple of H arrays (N, D).
    weights: (H, C, D)  per-head Linear weight.
    biases:  (H, C)     per-head Linear bias.
    Returns: (H, N, C) array of per-head softmax class scores; scores[h] is
             the h-th entry of the PyTorch cls_score list.
    """
    H, C, D = weights.shape
    c_pad = _round_up(C, 128)

    # pre-transpose + pad weights once in the wrapper: (H, C, D) -> (H, D, Cpad)
    w_t = jnp.transpose(weights, (0, 2, 1))                        # (H, D, C)
    w_pad = jnp.pad(w_t, ((0, 0), (0, 0), (0, c_pad - C)))         # (H, D, Cpad)
    b_pad = jnp.pad(biases.astype(jnp.float32),
                    ((0, 0), (0, c_pad - C)),
                    constant_values=_NEG)                          # (H, Cpad)

    per_head_fea = isinstance(fea, (list, tuple))
    if per_head_fea:
        assert len(fea) == H
        fea_arr = jnp.stack(fea, axis=0)                           # (H, N, D)
        N = fea_arr.shape[1]
    else:
        fea_arr = fea                                              # (N, D)
        N = fea_arr.shape[0]

    tn = min(block_n, _round_up(N, 8))          # sublane-aligned N tile
    n_pad = _round_up(N, tn)

    params = pltpu.CompilerParams(
        dimension_semantics=("parallel",),      # shard the N-tile axis (v7x)
        vmem_limit_bytes=32 * 1024 * 1024,      # explicit, fits v5e/v6e/v7x
    )

    if not per_head_fea:
        # ---- shared-feature fast path: one fused (tn, H*Cpad) matmul ----
        fea_p = jnp.pad(fea_arr, ((0, n_pad - N), (0, 0)))
        w2 = jnp.transpose(w_pad, (1, 0, 2)).reshape(D, H * c_pad)  # (D, H*Cpad)
        b2 = b_pad.reshape(1, H * c_pad)

        out = pl.pallas_call(
            functools.partial(_shared_fea_kernel, num_heads=H, c_pad=c_pad),
            out_shape=jax.ShapeDtypeStruct((n_pad, H * c_pad), jnp.float32),
            grid=(n_pad // tn,),
            in_specs=[
                pl.BlockSpec((tn, D), lambda i: (i, 0)),
                pl.BlockSpec((D, H * c_pad), lambda i: (0, 0)),    # resident
                pl.BlockSpec((1, H * c_pad), lambda i: (0, 0)),    # resident
            ],
            out_specs=pl.BlockSpec((tn, H * c_pad), lambda i: (i, 0)),
            compiler_params=params,
        )(fea_p, w2, b2)

        out = out[:N].reshape(N, H, c_pad)[:, :, :C]               # (N, H, C)
        return jnp.transpose(out, (1, 0, 2))                       # (H, N, C)

    # ---- per-head-feature path: one batched dot_general per N tile ----
    fea_p = jnp.pad(fea_arr, ((0, 0), (0, n_pad - N), (0, 0)))
    b3 = b_pad.reshape(H, 1, c_pad)

    out = pl.pallas_call(
        _multi_fea_kernel,
        out_shape=jax.ShapeDtypeStruct((H, n_pad, c_pad), jnp.float32),
        grid=(n_pad // tn,),
        in_specs=[
            pl.BlockSpec((H, tn, D), lambda i: (0, i, 0)),
            pl.BlockSpec((H, D, c_pad), lambda i: (0, 0, 0)),      # resident
            pl.BlockSpec((H, 1, c_pad), lambda i: (0, 0, 0)),      # resident
        ],
        out_specs=pl.BlockSpec((H, tn, c_pad), lambda i: (0, i, 0)),
        compiler_params=params,
    )(fea_p, w_pad, b3)

    return out[:, :N, :C]                                          # (H, N, C)


if __name__ == "__main__":
    # small synthetic configuration
    num_heads = 3      # len(multi_heads)
    num_cluster = 10   # multi_heads[0].num_cluster
    batch = 16
    feat_dim = 32

    key = jax.random.PRNGKey(0)
    k_fea, k_w, k_b, k_fl = jax.random.split(key, 4)

    fea = jax.random.normal(k_fea, (batch, feat_dim), dtype=jnp.float32)
    weights = 0.1 * jax.random.normal(
        k_w, (num_heads, num_cluster, feat_dim), dtype=jnp.float32)
    biases = 0.01 * jax.random.normal(
        k_b, (num_heads, num_cluster), dtype=jnp.float32)

    # shared-feature path
    scores = sem_head_multi_forward(fea, weights, biases)
    scores = jax.block_until_ready(scores)
    ref = jnp.stack([jax.nn.softmax(fea @ weights[h].T + biases[h], axis=-1)
                     for h in range(num_heads)], axis=0)
    assert scores.shape == (num_heads, batch, num_cluster)
    # approx reciprocal -> ~1e-3 relative error on the probabilities
    assert jnp.allclose(scores, ref, atol=2e-3, rtol=2e-3), "shared path mismatch"

    # per-head-feature (list) path
    fea_list = [jax.random.normal(k, (batch, feat_dim), dtype=jnp.float32)
                for k in jax.random.split(k_fl, num_heads)]
    scores_l = sem_head_multi_forward(fea_list, weights, biases)
    scores_l = jax.block_until_ready(scores_l)
    ref_l = jnp.stack(
        [jax.nn.softmax(fea_list[h] @ weights[h].T + biases[h], axis=-1)
         for h in range(num_heads)], axis=0)
    assert scores_l.shape == (num_heads, batch, num_cluster)
    assert jnp.allclose(scores_l, ref_l, atol=2e-3, rtol=2e-3), "list path mismatch"

    print("KERNEL_OK")
</pallas_src>

<mosaic_0001>
module attributes {stable_mosaic.version = 11 : i64} {
  func.func @_shared_fea_kernel(%arg0: i32, %arg1: memref<16x32xf32, #tpu.memory_space<vmem>>, %arg2: memref<32x384xf32, #tpu.memory_space<vmem>>, %arg3: memref<1x384xf32, #tpu.memory_space<vmem>>, %arg4: memref<16x384xf32, #tpu.memory_space<vmem>>) attributes {dimension_semantics = [#tpu.dimension_semantics<parallel>], iteration_bounds = array<i64: 1>, scalar_prefetch = 0 : i64, scratch_operands = 0 : i64, tpu.core_type = #tpu.core_type<tc>, window_params = [{transform_indices = @transform_0, window_bounds = array<i64: 16, 32>}, {pipeline_mode = #tpu.pipeline_mode<synchronous>, transform_indices = @transform_1, window_bounds = array<i64: 32, 384>}, {pipeline_mode = #tpu.pipeline_mode<synchronous>, transform_indices = @transform_2, window_bounds = array<i64: 1, 384>}, {transform_indices = @transform_3, window_bounds = array<i64: 16, 384>}]} {
    %c0 = arith.constant 0 : index
    %c0_0 = arith.constant 0 : index
    %0 = vector.load %arg1[%c0, %c0_0] : memref<16x32xf32, #tpu.memory_space<vmem>>, vector<16x32xf32>
    %c0_1 = arith.constant 0 : index
    %c0_2 = arith.constant 0 : index
    %1 = vector.load %arg2[%c0_1, %c0_2] : memref<32x384xf32, #tpu.memory_space<vmem>>, vector<32x384xf32>
    %cst = arith.constant dense<0.000000e+00> : vector<16x384xf32>
    %2 = tpu.matmul %0, %1, %cst {dimension_numbers = #tpu.dot_dimension_numbers<[1], [0], [0], [1], [0, 0, 1, 1], [], []>} : vector<16x32xf32>, vector<32x384xf32>, vector<16x384xf32> -> vector<16x384xf32>
    %c0_3 = arith.constant 0 : index
    %c0_4 = arith.constant 0 : index
    %3 = vector.load %arg3[%c0_3, %c0_4] : memref<1x384xf32, #tpu.memory_space<vmem>>, vector<1x384xf32>
    %4 = vector.broadcast %3 : vector<1x384xf32> to vector<16x384xf32>
    %5 = arith.addf %2, %4 : vector<16x384xf32>
    %6 = vector.extract_strided_slice %5 {offsets = [0, 0], sizes = [16, 128], strides = [1, 1]} : vector<16x384xf32> to vector<16x128xf32>
    %cst_5 = arith.constant dense<0xFF800000> : vector<16xf32>
    %7 = vector.multi_reduction <maximumf>, %6, %cst_5 [1] : vector<16x128xf32> to vector<16xf32>
    %8 = vector.shape_cast %7 : vector<16xf32> to vector<16x1xf32>
    %9 = vector.broadcast %8 : vector<16x1xf32> to vector<16x128xf32>
    %10 = arith.subf %6, %9 : vector<16x128xf32>
    %11 = math.exp %10 : vector<16x128xf32>
    %cst_6 = arith.constant dense<0.000000e+00> : vector<16xf32>
    %12 = vector.multi_reduction <add>, %11, %cst_6 [1] : vector<16x128xf32> to vector<16xf32>
    %13 = vector.shape_cast %12 : vector<16xf32> to vector<16x1xf32>
    %14 = tpu.reciprocal %13 {approx = true} : vector<16x1xf32> -> vector<16x1xf32>
    %15 = vector.broadcast %14 : vector<16x1xf32> to vector<16x128xf32>
    %16 = arith.mulf %11, %15 : vector<16x128xf32>
    %c0_7 = arith.constant 0 : index
    %c0_8 = arith.constant 0 : index
    %17 = vector.load %arg4[%c0_7, %c0_8] : memref<16x384xf32, #tpu.memory_space<vmem>>, vector<16x128xf32>
    tpu.vector_store %arg4[%c0_7, %c0_8], %16 {strides = array<i32>} : memref<16x384xf32, #tpu.memory_space<vmem>>, vector<16x128xf32>,
    %18 = vector.extract_strided_slice %5 {offsets = [0, 128], sizes = [16, 128], strides = [1, 1]} : vector<16x384xf32> to vector<16x128xf32>
    %cst_9 = arith.constant dense<0xFF800000> : vector<16xf32>
    %19 = vector.multi_reduction <maximumf>, %18, %cst_9 [1] : vector<16x128xf32> to vector<16xf32>
    %20 = vector.shape_cast %19 : vector<16xf32> to vector<16x1xf32>
    %21 = vector.broadcast %20 : vector<16x1xf32> to vector<16x128xf32>
    %22 = arith.subf %18, %21 : vector<16x128xf32>
    %23 = math.exp %22 : vector<16x128xf32>
    %cst_10 = arith.constant dense<0.000000e+00> : vector<16xf32>
    %24 = vector.multi_reduction <add>, %23, %cst_10 [1] : vector<16x128xf32> to vector<16xf32>
    %25 = vector.shape_cast %24 : vector<16xf32> to vector<16x1xf32>
    %26 = tpu.reciprocal %25 {approx = true} : vector<16x1xf32> -> vector<16x1xf32>
    %27 = vector.broadcast %26 : vector<16x1xf32> to vector<16x128xf32>
    %28 = arith.mulf %23, %27 : vector<16x128xf32>
    %c0_11 = arith.constant 0 : index
    %c128 = arith.constant 128 : index
    %29 = vector.load %arg4[%c0_11, %c128] : memref<16x384xf32, #tpu.memory_space<vmem>>, vector<16x128xf32>
    tpu.vector_store %arg4[%c0_11, %c128], %28 {strides = array<i32>} : memref<16x384xf32, #tpu.memory_space<vmem>>, vector<16x128xf32>,
    %30 = vector.extract_strided_slice %5 {offsets = [0, 256], sizes = [16, 128], strides = [1, 1]} : vector<16x384xf32> to vector<16x128xf32>
    %cst_12 = arith.constant dense<0xFF800000> : vector<16xf32>
    %31 = vector.multi_reduction <maximumf>, %30, %cst_12 [1] : vector<16x128xf32> to vector<16xf32>
    %32 = vector.shape_cast %31 : vector<16xf32> to vector<16x1xf32>
    %33 = vector.broadcast %32 : vector<16x1xf32> to vector<16x128xf32>
    %34 = arith.subf %30, %33 : vector<16x128xf32>
    %35 = math.exp %34 : vector<16x128xf32>
    %cst_13 = arith.constant dense<0.000000e+00> : vector<16xf32>
    %36 = vector.multi_reduction <add>, %35, %cst_13 [1] : vector<16x128xf32> to vector<16xf32>
    %37 = vector.shape_cast %36 : vector<16xf32> to vector<16x1xf32>
    %38 = tpu.reciprocal %37 {approx = true} : vector<16x1xf32> -> vector<16x1xf32>
    %39 = vector.broadcast %38 : vector<16x1xf32> to vector<16x128xf32>
    %40 = arith.mulf %35, %39 : vector<16x128xf32>
    %c0_14 = arith.constant 0 : index
    %c256 = arith.constant 256 : index
    %41 = vector.load %arg4[%c0_14, %c256] : memref<16x384xf32, #tpu.memory_space<vmem>>, vector<16x128xf32>
    tpu.vector_store %arg4[%c0_14, %c256], %40 {strides = array<i32>} : memref<16x384xf32, #tpu.memory_space<vmem>>, vector<16x128xf32>,
    return
  }
  func.func @transform_0(%arg0: i32) -> (i32, i32) {
    %c0_i32 = arith.constant 0 : i32
    %c0_i32_0 = arith.constant 0 : i32
    return %arg0, %c0_i32 : i32, i32
  }
  func.func @transform_1(%arg0: i32) -> (i32, i32) {
    %c0_i32 = arith.constant 0 : i32
    %c0_i32_0 = arith.constant 0 : i32
    %c0_i32_1 = arith.constant 0 : i32
    return %c0_i32, %c0_i32_0 : i32, i32
  }
  func.func @transform_2(%arg0: i32) -> (i32, i32) {
    %c0_i32 = arith.constant 0 : i32
    %c0_i32_0 = arith.constant 0 : i32
    %c0_i32_1 = arith.constant 0 : i32
    return %c0_i32, %c0_i32_0 : i32, i32
  }
  func.func @transform_3(%arg0: i32) -> (i32, i32) {
    %c0_i32 = arith.constant 0 : i32
    %c0_i32_0 = arith.constant 0 : i32
    return %arg0, %c0_i32 : i32, i32
  }
}

</mosaic_0001>

<bundles_post_ra>
// kernel: tpu_custom_call.1
= control target key start
LH: loop header
LB: loop body
LE: loop exit
PB: predicated region body
PF: predicated region fallthrough
CT: control target
= control target key end

     0   :  { %8 = vsyncpa [#allocation3], 0  ;;  %s529_s0 = inlined_call_operand.hbm [shape: f32[16,32], index: 0, kind: input, shape index: {}]   ;;  %s530_s1 = inlined_call_operand.hbm [shape: f32[32,384], index: 1, kind: input, shape index: {}]   ;;  %s531_s2 = inlined_call_operand.vmem [shape: f32[1,384], index: 2, kind: input, shape index: {}]   ;;  %s532_s3 = inlined_call_operand.hbm [shape: f32[16,384], index: 3, kind: output, shape index: {}]  }
   0x1   :  { %9 = vsyncpa [#allocation6], 0 }
   0x2   :  { %10 = vsyncpa [#allocation4], 0  ;;  %s452_s12 = smov [#allocation2]   ;;  %s380_s16 = scalar_lea.hbm %s529_s0, 256 }
   0x3   :  { %s16_s13 = sshll.u32 %s452_s12, 4  ;;  %p381_p0 = scmp.ne.s32.totalorder %s529_s0, %s380_s16  ;;  %s17_s13 = int_to_ptr.vmem [resolvable:$true] %s16_s13 }
   0x4   :  { %p384_p1 = scmp.lt.u32.totalorder %s380_s16, %s529_s0 }
   0x6   :  { %p386_p2 = pnand %p384_p1, %p381_p0 }
   0x8   :  { %389 = shalt.err (!%p386_p2)
}
   0x9   :  { %s390_s21 = scalar_lea.vmem %s17_s13, 256  ;;  %p395_p4 = scmp.lt.s32.totalorder %s17_s13, %s17_s13 }
   0xa   :  { %p391_p3 = scmp.ne.s32.totalorder %s17_s13, %s390_s21  ;;  %p396_p5 = scmp.lt.s32.totalorder %s390_s21, %s390_s21 }
   0xc   :  { %p397_p6 = por %p396_p5, %p395_p4 }
   0xe   :  { %p398_p7 = pnand %p397_p6, %p391_p3 }
  0x10   :  { %401 = shalt.err (!%p398_p7)
}
  0x11   :  { %s453_s22 = smov 128   ;;  %s454_s23 = smov 8  }
  0x12   :  { %22 = dma.hbm_to_vmem [thread:$0]  %s529_s0, 256, %s17_s13, [#allocation3], %s453_s22, %s453_s22, %s454_s23  }
  0x13   :  { %s455_s26 = smov [#allocation5]   ;;  %s402_s30 = scalar_lea.hbm %s530_s1, 1536 }
  0x14   :  { %s28_s27 = sshll.u32 %s455_s26, 4  ;;  %p403_p8 = scmp.ne.s32.totalorder %s530_s1, %s402_s30  ;;  %s29_s27 = int_to_ptr.vmem [resolvable:$true] %s28_s27 }
  0x15   :  { %p406_p9 = scmp.lt.u32.totalorder %s402_s30, %s530_s1 }
  0x17   :  { %p408_p10 = pnand %p406_p9, %p403_p8 }
  0x19   :  { %411 = shalt.err (!%p408_p10)
}
  0x1a   :  { %s412_s8 = scalar_lea.vmem %s29_s27, 1536  ;;  %p417_p12 = scmp.lt.s32.totalorder %s29_s27, %s29_s27 }
  0x1b   :  { %p413_p11 = scmp.ne.s32.totalorder %s29_s27, %s412_s8  ;;  %p418_p13 = scmp.lt.s32.totalorder %s412_s8, %s412_s8 }
  0x1d   :  { %p419_p0 = por %p418_p13, %p417_p12 }
  0x1f   :  { %p420_p1 = pnand %p419_p0, %p413_p11 }
  0x21   :  { %423 = shalt.err (!%p420_p1)
}
  0x22   :  { %s456_s0 = smov 384   ;;  %s457_s9 = smov 24  }
  0x23   :  { %34 = dma.hbm_to_vmem [thread:$0]  %s530_s1, 1536, %s29_s27, [#allocation6], %s456_s0, %s456_s0, %s457_s9  }
  0x24   :  { %446 = dma.done.wait [#allocation3], 256  }
  0x25   :  { %447 = vsyncadd [#allocation3], 4294967040 }
  0x26   :  { %448 = dma.done.wait [#allocation6], 1536  }
  0x27   :  { %449 = vsyncadd [#allocation6], 4294965760  ;;  %v458_v0 = vmov 0.0   ;;  %v46_v1 = vld [vmem:[#allocation5 + $0x8] sm:$0xff]  ;;  %v49_v2 = vld [vmem:[#allocation5 + $0x20] sm:$0xff]  ;;  %vm74_vm0 = vcmask 261120   ;;  %v59_v21 = vlaneseq }
  0x28   :  { %145 = vmatprep.mubr.f32.mxu0 %v458_v0  ;;  %v45_v3 = vld [vmem:[#allocation5] sm:$0xff]  ;;  %v332_v4 = vpack.c.bf16 %v49_v2, %v46_v1  ;;  %v48_v5 = vld [vmem:[#allocation5 + $0x18] sm:$0xff]  ;;  %v55_v7 = vld [vmem:[#allocation5 + $0x50] sm:$0xff] }
  0x29   :  { %v52_v6 = vld [vmem:[#allocation5 + $0x38] sm:$0xff]  ;;  %v334_v8 = vpack.c.bf16 %v48_v5, %v45_v3  ;;  %v51_v10 = vld [vmem:[#allocation5 + $0x30] sm:$0xff]  ;;  %v54_v11 = vld [vmem:[#allocation5 + $0x48] sm:$0xff]  ;;  %v60_v22 = vshrl.u32 %v59_v21, 7 }
  0x2a   :  { %v336_v9 = vpack.c.bf16 %v55_v7, %v52_v6  ;;  %v47_v12 = vld [vmem:[#allocation5 + $0x10] sm:$0xff]  ;;  %333 = vmatprep.subr.bf16.mxu0 %v332_v4  ;;  %v50_v13 = vld [vmem:[#allocation5 + $0x28] sm:$0xff]  ;;  %v53_v15 = vld [vmem:[#allocation5 + $0x40] sm:$0xff]  ;;  %v338_v16 = vpack.c.bf16 %v54_v11, %v51_v10 }
  0x2b   :  { %v43_v14 = vld [vmem:[#allocation2] sm:$0xff]  ;;  %335 = vmatpush1.bf16.msra.mxu0 %v334_v8  ;;  %v340_v17 = vpack.c.bf16 %v50_v13, %v47_v12  ;;  %v56_v18 = vld [vmem:[#allocation5 + $0x58] sm:$0xff]  ;;  %v61_v23 = vsub.s32 0, %v60_v22  ;;  %v65_v25 = vsub.s32 1, %v60_v22  ;;  %v69_v28 = vsub.s32 2, %v60_v22 }
  0x2c   :  { %329 = vmatprep.mubr.msk.f32.mxu1 %vm74_vm0, %v43_v14  ;;  %337 = vmatprep.subr.bf16.mxu0 %v336_v9  ;;  %v344_v19 = vpack.c.bf16 %v56_v18, %v53_v15  ;;  %v44_v20 = vld [vmem:[#allocation2 + $0x8] sm:$0xff]  ;;  %v57_v24 = vld [vmem:[%s531_s2] sm:$0x7]  ;;  %s459_s2 = smov [#allocation7]  }
  0x2d   :  { %341 = vmatprep.subr.bf16.mxu1 %v340_v17  ;;  %v62_v26 = vrot.slane %v57_v24, %v61_v23  ;;  %v66_v27 = vrot.slane %v57_v24, %v65_v25  ;;  %v70_v33 = vrot.slane %v57_v24, %v69_v28  ;;  %s298_s13 = sshll.u32 %s459_s2, 4  ;;  %s299_s13 = int_to_ptr.vmem [resolvable:$true] %s298_s13 }
  0x2e   :  { %343 = vmatpush3.bf16.msra.mxu1 %v340_v17  ;;  %s424_s14 = scalar_lea.vmem %s299_s13, 768  ;;  %p429_p3 = scmp.lt.s32.totalorder %s299_s13, %s299_s13 }
  0x2f   :  { %339 = vmatpush1.bf16.msra.mxu0 %v338_v16  ;;  %345 = vmatprep.subr.bf16.mxu1 %v344_v19  ;;  %p425_p2 = scmp.ne.s32.totalorder %s299_s13, %s424_s14  ;;  %p430_p4 = scmp.lt.s32.totalorder %s424_s14, %s424_s14 }
  0x31   :  { %p431_p5 = por %p430_p4, %p429_p3 }
  0x32   :  { %311 = vmatmul.mubr.msk.f32.vlgmr.msra.gmra.mrb[0].mxu0 %vm74_vm0, %v43_v14  ;;  %347 = vmatpush3.bf16.msra.mxu1 %v344_v19 }
  0x33   :  { %151 = vmatprep.mubr.f32.mxu0 %v458_v0  ;;  %p432_p6 = pnand %p431_p5, %p425_p2 }
  0x35   :  { %330 = vmatmul.mubr.msk.f32.vlgmr.msra.gmra.mrb[0].mxu1 %vm74_vm0, %v44_v20 }
  0x36   :  { %312 = vmatmul.mubr.msk.f32.gmra.mrb[2].mxu0 %vm74_vm0, %v44_v20 }
 0x105   :  { %v147_v29 = vpop.f32.mrb[0].mxu0 }
 0x106   :  { %v148_v30 = vadd.f32 %v147_v29, %v62_v26  ;;  %v149_v31 = vpop.f32.mrb[1].mxu0 }
 0x107   :  { %v150_v32 = vadd.f32 %v149_v31, %v66_v27 }
 0x108   :  { %233 = vmax.xlane.f32.xlu0 %v148_v30  ;;  %v331_v34 = vpop.f32.mrb[0].mxu1 }
 0x109   :  { %v153_v35 = vpop.f32.mrb[2].mxu0  ;;  %253 = vmax.xlane.f32.xlu1 %v150_v32  ;;  %v224_v36 = vpop.f32.mrb[1].mxu1  ;;  %v230_v41 = vadd.f32 %v331_v34, %v70_v33 }
 0x10a   :  { %v154_v37 = vadd.f32 %v153_v35, %v62_v26  ;;  %v155_v38 = vpop.f32.mrb[3].mxu0  ;;  %v225_v40 = vadd.f32 %v224_v36, %v70_v33 }
 0x10b   :  { %v156_v39 = vadd.f32 %v155_v38, %v66_v27 }
 0x10c   :  { %235 = vmax.xlane.f32.xlu0 %v154_v37 }
 0x10d   :  { %255 = vmax.xlane.f32.xlu1 %v156_v39 }
 0x110   :  { %273 = vmax.xlane.f32.xlu0 %v225_v40 }
 0x111   :  { %275 = vmax.xlane.f32.xlu1 %v230_v41 }
 0x195   :  { %v234_v42 = vpop.xlane.xlu0 %233 }
 0x196   :  { %v237_v43 = vsub.f32 %v148_v30, %v234_v42  ;;  %v254_v44 = vpop.xlane.xlu1 %253 }
 0x197   :  { %v257_v45 = vsub.f32 %v150_v32, %v254_v44 }
 0x198   :  { %v239_v46 = vmul.f32 1.442695, %v237_v43 }
 0x199   :  { %v259_v47 = vmul.f32 1.442695, %v257_v45  ;;  %v236_v48 = vpop.xlane.xlu0 %235 }
 0x19a   :  { %356 = vpow2.f32 %v239_v46  ;;  %v238_v49 = vsub.f32 %v154_v37, %v236_v48  ;;  %v256_v50 = vpop.xlane.xlu1 %255 }
 0x19b   :  { %v258_v51 = vsub.f32 %v156_v39, %v256_v50  ;;  %358 = vpow2.f32 %v259_v47 }
 0x19c   :  { %v241_v52 = vmul.f32 1.442695, %v238_v49 }
 0x19d   :  { %v261_v53 = vmul.f32 1.442695, %v258_v51  ;;  %v274_v54 = vpop.xlane.xlu0 %273 }
 0x19e   :  { %360 = vpow2.f32 %v241_v52  ;;  %v277_v55 = vsub.f32 %v225_v40, %v274_v54  ;;  %v276_v56 = vpop.xlane.xlu1 %275 }
 0x19f   :  { %v278_v57 = vsub.f32 %v230_v41, %v276_v56  ;;  %362 = vpow2.f32 %v261_v53 }
 0x1a0   :  { %v279_v58 = vmul.f32 1.442695, %v277_v55 }
 0x1a1   :  { %v281_v59 = vmul.f32 1.442695, %v278_v57 }
 0x1a2   :  { %364 = vpow2.f32 %v279_v58 }
 0x1a3   :  { %366 = vpow2.f32 %v281_v59 }
 0x1a4   :  { %v357_v60 = vpop.eup %356 }
 0x1a5   :  { %243 = vadd.xlane.f32.xlu0 %v357_v60  ;;  %v359_v61 = vpop.eup %358 }
 0x1a8   :  { %v361_v62 = vpop.eup %360 }
 0x1a9   :  { %263 = vadd.xlane.f32.xlu0 %v359_v61  ;;  %245 = vadd.xlane.f32.xlu1 %v361_v62  ;;  %v363_v63 = vpop.eup %362 }
 0x1ac   :  { %v365_v0 = vpop.eup %364 }
 0x1ad   :  { %265 = vadd.xlane.f32.xlu1 %v363_v63  ;;  %283 = vadd.xlane.f32.xlu0 %v365_v0  ;;  %v367_v1 = vpop.eup %366 }
 0x1b1   :  { %285 = vadd.xlane.f32.xlu1 %v367_v1 }
 0x232   :  { %v244_v2 = vpop.xlane.xlu0 %243 }
 0x233   :  { %368 = vrcp.f32 %v244_v2 }
 0x236   :  { %v246_v3 = vpop.xlane.xlu1 %245  ;;  %v264_v4 = vpop.xlane.xlu0 %263 }
 0x237   :  { %370 = vrcp.f32 %v246_v3 }
 0x238   :  { %372 = vrcp.f32 %v264_v4 }
 0x23a   :  { %v266_v5 = vpop.xlane.xlu1 %265  ;;  %v284_v6 = vpop.xlane.xlu0 %283 }
 0x23b   :  { %374 = vrcp.f32 %v266_v5 }
 0x23c   :  { %376 = vrcp.f32 %v284_v6 }
 0x23d   :  { %v369_v7 = vpop.eup %368 }
 0x23e   :  { %v249_v8 = vmul.f32 %v369_v7, %v357_v60  ;;  %v286_v9 = vpop.xlane.xlu1 %285 }
 0x23f   :  { %378 = vrcp.f32 %v286_v9 }
 0x240   :  { %251 = vst [vmem:[#allocation7] sm:$0xff] %v249_v8 }
 0x241   :  { %v371_v10 = vpop.eup %370 }
 0x242   :  { %v373_v11 = vpop.eup %372  ;;  %v250_v12 = vmul.f32 %v371_v10, %v361_v62 }
 0x243   :  { %v269_v13 = vmul.f32 %v373_v11, %v359_v61 }
 0x244   :  { %252 = vst [vmem:[#allocation7 + $0x18] sm:$0xff] %v250_v12 }
 0x245   :  { %v375_v14 = vpop.eup %374  ;;  %271 = vst [vmem:[#allocation7 + $0x8] sm:$0xff] %v269_v13 }
 0x246   :  { %v377_v15 = vpop.eup %376  ;;  %v270_v16 = vmul.f32 %v375_v14, %v363_v63 }
 0x247   :  { %v289_v17 = vmul.f32 %v377_v15, %v365_v0 }
 0x248   :  { %272 = vst [vmem:[#allocation7 + $0x20] sm:$0xff] %v270_v16 }
 0x249   :  { %v379_v18 = vpop.eup %378  ;;  %291 = vst [vmem:[#allocation7 + $0x10] sm:$0xff] %v289_v17 }
 0x24a   :  { %v290_v19 = vmul.f32 %v379_v18, %v367_v1 }
 0x24c   :  { %292 = vst [vmem:[#allocation7 + $0x28] sm:$0xff] %v290_v19 }
 0x24d   :  { %435 = shalt.err (!%p432_p6)
}
 0x24e   :  { %s436_s17 = scalar_lea.hbm %s532_s3, 768 }
 0x24f   :  { %p437_p7 = scmp.ne.s32.totalorder %s532_s3, %s436_s17  ;;  %p440_p8 = scmp.lt.u32.totalorder %s436_s17, %s532_s3 }
 0x251   :  { %p442_p9 = pnand %p440_p8, %p437_p7 }
 0x253   :  { %445 = shalt.err (!%p442_p9)
}
 0x254   :  { %304 = dma.vmem_to_hbm [thread:$0]  %s299_s13, 768, %s532_s3, [#allocation4], %s456_s0, %s456_s0, %s457_s9  }
 0x255   :  { %450 = dma.done.wait [#allocation4], 768  }
 0x256   :  { %451 = vsyncadd [#allocation4], 4294966528 }
 0x257   :  { %308 = vsyncpa [#allocation3], 1 }
 0x258   :  { %309 = vsyncpa [#allocation6], 1 }
 0x259   :  { %310 = vsyncpa [#allocation4], 1 }

</bundles_post_ra>
